<compile_context>
chip_gen: v7x
topology: tpu7x:2x2x1
jax: 0.10.0
libtpu: 0.0.40
codegen_flags: <defaults>
</compile_context>

<pallas_src>
import functools

import numpy as np
import jax
import jax.numpy as jnp
from jax.experimental import pallas as pl
from jax.experimental.pallas import tpu as pltpu

EPS = 1e-5
ACT_DTYPE = jnp.bfloat16
VMEM_LIMIT = 48 * 1024 * 1024


# --------------------------- sinc conv ---------------------------------------

def _sinc_kernel(x_ref, w_ref, o_ref):
    # x_ref: (1, TM, 264) stride-8 waveform windows; w_ref: (264, 8*128)
    # o_ref: (1, TM, 1024); row m, lanes r*128+co hold y[8m+r, co]
    o_ref[0] = jnp.dot(x_ref[0], w_ref[...],
                       preferred_element_type=jnp.float32).astype(o_ref.dtype)


def sinc_conv(x, w_sinc, *, tm=512):
    """Conv1d(1->128, k=251, stride=1, pad=125, bias=False), channels-last out."""
    B, L = x.shape
    Cout, _, K = w_sinc.shape                       # (128, 1, 251)
    assert L % 8 == 0, "waveform length must be a multiple of 8"
    M = L // 8
    TM = min(tm, M)
    nMt = pl.cdiv(M, TM)
    M_pad = nMt * TM

    # left pad = 125 (the true conv padding); right pad so every stride-8 window
    # of width 264 exists (the extra zeros only ever hit zero weight entries).
    pad_l = K // 2
    xp = jnp.pad(x, ((0, 0), (pad_l, 8 * M_pad + 256 - pad_l - L)))
    xp2 = xp.reshape(B, M_pad + 32, 8)
    # Xs[b, m, 8i+j] = xp[b, 8m + 8i + j]   (expansion 264/8 = 33x, no gather)
    xs = jnp.concatenate([xp2[:, i:i + M_pad, :] for i in range(33)], axis=-1)
    xs = xs.astype(ACT_DTYPE)

    # block-Toeplitz weight: Wb[j, r*Cout + co] = w[co, j - r]  (zero otherwise)
    wt = jnp.transpose(w_sinc[:, 0, :])             # (251, Cout)
    wb = jnp.zeros((264, 8, Cout), jnp.float32)
    for r in range(8):
        wb = wb.at[r:r + K, r, :].set(wt)
    wb = wb.reshape(264, 8 * Cout).astype(ACT_DTYPE)

    out = pl.pallas_call(
        _sinc_kernel,
        out_shape=jax.ShapeDtypeStruct((B, M_pad, 8 * Cout), ACT_DTYPE),
        grid=(B, nMt),
        in_specs=[
            pl.BlockSpec((1, TM, 264), lambda b, m: (b, m, 0)),
            pl.BlockSpec((264, 8 * Cout), lambda b, m: (0, 0)),
        ],
        out_specs=pl.BlockSpec((1, TM, 8 * Cout), lambda b, m: (b, m, 0)),
        compiler_params=pltpu.CompilerParams(
            dimension_semantics=("parallel", "parallel"),
            vmem_limit_bytes=VMEM_LIMIT),
    )(xs, wb)
    # (B, M_pad, 8*Cout) -> (B, 8*M_pad, Cout) is a free row-major reshape.
    return out.reshape(B, 8 * M_pad, Cout)[:, :L, :]


# --------------------------- fused res block ---------------------------------

def _res_block_kernel(x_hbm, w0_ref, b0_ref, w1_ref, b1_ref, o_ref,
                      xbuf, c1_scr, sem, *, tp, l_in):
    b = pl.program_id(0)
    t = pl.program_id(1)
    w = xbuf.shape[0]                               # 2*tp + 6 (core + conv halo)
    row0 = pl.multiple_of(t * (2 * tp), 2 * tp)

    # Overlapping halo windows can't be expressed with a Blocked BlockSpec, so
    # the zero-padded input stays in HBM (pl.ANY) and each step DMAs its window.
    cp = pltpu.make_async_copy(x_hbm.at[b, pl.ds(row0, w), :], xbuf, sem)
    cp.start()
    cp.wait()
    # TODO(synk): a 2-slot xbuf + prefetch of the next window would hide this DMA.

    # conv0 (k=3, p=1) + folded BN + ReLU; rows cover absolute [2*tp*t-2, 2*tp*t+2*tp+2)
    xcat = jnp.concatenate(
        [xbuf[pl.ds(0, w - 2), :], xbuf[pl.ds(1, w - 2), :], xbuf[pl.ds(2, w - 2), :]],
        axis=1)                                     # (w-2, 3*Cin)
    h0 = jnp.dot(xcat, w0_ref[...], preferred_element_type=jnp.float32) + b0_ref[...]
    h0 = jnp.maximum(h0, 0.0)
    # zero rows outside the true sequence (= conv1's zero padding in PyTorch)
    r0 = jax.lax.broadcasted_iota(jnp.int32, (w - 2, 1), 0) + (2 * tp * t - 2)
    h0 = jnp.where((r0 >= 0) & (r0 < l_in), h0, 0.0).astype(xbuf.dtype)

    # conv1 (k=3, p=1) + folded BN + ReLU; rows cover absolute [2*tp*t-1, 2*tp*t+2*tp+1)
    wh = w - 2
    hcat = jnp.concatenate([h0[0:wh - 2], h0[1:wh - 1], h0[2:wh]], axis=1)
    c1 = jnp.dot(hcat, w1_ref[...], preferred_element_type=jnp.float32) + b1_ref[...]
    c1 = jnp.maximum(c1, 0.0)
    r1 = jax.lax.broadcasted_iota(jnp.int32, (wh - 2, 1), 0) + (2 * tp * t - 1)
    # post-ReLU values are >= 0, so masking to 0 == MaxPool1d's -inf padding.
    c1_scr[...] = jnp.where((r1 >= 0) & (r1 < l_in), c1, 0.0)

    # MaxPool1d(k=3, s=2, p=1): out[p] = max(c1[2p-1], c1[2p], c1[2p+1]) absolute,
    # i.e. local rows 2p, 2p+1, 2p+2 of c1_scr -> three stride-2 loads.
    p0 = c1_scr[pl.ds(0, tp, 2), :]
    p1 = c1_scr[pl.ds(1, tp, 2), :]
    p2 = c1_scr[pl.ds(2, tp, 2), :]
    o_ref[0] = jnp.maximum(jnp.maximum(p0, p1), p2).astype(o_ref.dtype)


def _fold_bn(w, b, gamma, beta, mean, var):
    # PyTorch Conv1d weight (Cout, Cin, 3) -> (3*Cin, Cout) with the eval-mode
    # BatchNorm scale folded in; bias = (b - mean) * scale + beta.
    cout = w.shape[0]
    scale = gamma / jnp.sqrt(var + EPS)
    wk = jnp.transpose(w, (2, 1, 0)).reshape(-1, cout) * scale[None, :]
    bias = (b - mean) * scale + beta
    return wk.astype(ACT_DTYPE), bias.reshape(1, cout).astype(jnp.float32)


def fused_res_block(x, blk, *, tp=512):
    """[Conv1d(k3,p1)+BN+ReLU] x2 + MaxPool1d(k3,s2,p1), fused per time tile."""
    B, l_in, cin = x.shape
    assert l_in % 2 == 0
    cout = blk["conv0_w"].shape[0]
    lp = l_in // 2                                   # pooled length
    tp = min(tp, lp)
    nt = pl.cdiv(lp, tp)
    lp_pad = nt * tp

    w0, b0 = _fold_bn(blk["conv0_w"], blk["conv0_b"], blk["bn0_gamma"],
                      blk["bn0_beta"], blk["bn0_mean"], blk["bn0_var"])
    w1, b1 = _fold_bn(blk["conv1_w"], blk["conv1_b"], blk["bn1_gamma"],
                      blk["bn1_beta"], blk["bn1_mean"], blk["bn1_var"])

    # zero-pad so tile t's window [2*tp*t - 3, 2*tp*t + 2*tp + 3) always exists
    xpad = jnp.pad(x.astype(ACT_DTYPE),
                   ((0, 0), (3, 2 * lp_pad + 3 - l_in), (0, 0)))
    win = 2 * tp + 6

    out = pl.pallas_call(
        functools.partial(_res_block_kernel, tp=tp, l_in=l_in),
        out_shape=jax.ShapeDtypeStruct((B, lp_pad, cout), ACT_DTYPE),
        grid=(B, nt),
        in_specs=[
            pl.BlockSpec(memory_space=pl.ANY),                 # input stays in HBM
            pl.BlockSpec((3 * cin, cout), lambda b, t: (0, 0)),
            pl.BlockSpec((1, cout), lambda b, t: (0, 0)),
            pl.BlockSpec((3 * cout, cout), lambda b, t: (0, 0)),
            pl.BlockSpec((1, cout), lambda b, t: (0, 0)),
        ],
        out_specs=pl.BlockSpec((1, tp, cout), lambda b, t: (b, t, 0)),
        scratch_shapes=[
            pltpu.VMEM((win, cin), ACT_DTYPE),                 # halo'd input window
            pltpu.VMEM((2 * tp + 2, cout), jnp.float32),       # conv1 output (pre-pool)
            pltpu.SemaphoreType.DMA,
        ],
        compiler_params=pltpu.CompilerParams(
            dimension_semantics=("parallel", "parallel"),
            vmem_limit_bytes=VMEM_LIMIT),
    )(xpad, w0, b0, w1, b1)
    return out[:, :lp, :]


# --------------------------- GAP + classifier --------------------------------

def _gap_mlp_kernel(x_ref, w1_ref, b1_ref, w2_ref, b2_ref, w3_ref, b3_ref,
                    o_ref, acc_ref, *, inv_n):
    t = pl.program_id(0)

    @pl.when(t == 0)
    def _():
        acc_ref[...] = jnp.zeros_like(acc_ref)

    acc_ref[...] += jnp.sum(x_ref[...].astype(jnp.float32), axis=1)

    @pl.when(t == pl.num_programs(0) - 1)
    def _():
        g = acc_ref[...] * inv_n                               # global average pool
        h = jnp.maximum(jnp.dot(g, w1_ref[...], preferred_element_type=jnp.float32)
                        + b1_ref[...], 0.0)
        h = jnp.maximum(jnp.dot(h, w2_ref[...], preferred_element_type=jnp.float32)
                        + b2_ref[...], 0.0)
        logit = jnp.dot(h, w3_ref[...], preferred_element_type=jnp.float32) + b3_ref[...]
        o_ref[...] = 1.0 / (1.0 + jnp.exp(-logit))


def gap_classifier(x, params, *, tg=2048):
    """AdaptiveAvgPool1d(1) + MLP 512->256->128->1 + sigmoid (time-tiled sum)."""
    B, lt, c = x.shape
    tg = min(tg, lt)
    nt = pl.cdiv(lt, tg)
    xpad = jnp.pad(x, ((0, 0), (0, nt * tg - lt), (0, 0)))     # zeros don't change the sum

    d1, d2 = params["fc0_w"].shape[0], params["fc1_w"].shape[0]
    out = pl.pallas_call(
        functools.partial(_gap_mlp_kernel, inv_n=1.0 / lt),
        out_shape=jax.ShapeDtypeStruct((B, 1), jnp.float32),
        grid=(nt,),
        in_specs=[
            pl.BlockSpec((B, tg, c), lambda t: (0, t, 0)),
            pl.BlockSpec((c, d1), lambda t: (0, 0)),
            pl.BlockSpec((1, d1), lambda t: (0, 0)),
            pl.BlockSpec((d1, d2), lambda t: (0, 0)),
            pl.BlockSpec((1, d2), lambda t: (0, 0)),
            pl.BlockSpec((d2, 1), lambda t: (0, 0)),
            pl.BlockSpec((1, 1), lambda t: (0, 0)),
        ],
        out_specs=pl.BlockSpec((B, 1), lambda t: (0, 0)),
        scratch_shapes=[pltpu.VMEM((B, c), jnp.float32)],
        compiler_params=pltpu.CompilerParams(
            dimension_semantics=("arbitrary",),
            vmem_limit_bytes=VMEM_LIMIT),
    )(xpad,
      params["fc0_w"].T, params["fc0_b"][None, :],
      params["fc1_w"].T, params["fc1_b"][None, :],
      params["fc2_w"].T, params["fc2_b"][None, :])
    return out


# --------------------------- forward -----------------------------------------

def rawnet2_forward(x, params, *, tm=512, tp=512, tg=2048):
    # x: (B, L) waveform -> (B,) sigmoid scores (matches output.squeeze() for B > 1).
    h = sinc_conv(x, params["sinc_w"], tm=tm)                  # (B, L, 128) bf16
    for blk in params["blocks"]:
        h = fused_res_block(h, blk, tp=tp)                     # halves the time axis
    out = gap_classifier(h, params, tg=tg)                     # (B, 1) f32
    # TODO(synk): torch's output.squeeze() returns a 0-d tensor when B == 1.
    return jnp.squeeze(out, axis=-1)


# --------------------------- reference (pure JAX / XLA, f32) ------------------

def rawnet2_reference(x, params):
    dn = ("NCH", "OIH", "NCH")
    h = jax.lax.conv_general_dilated(x[:, None, :], params["sinc_w"], (1,),
                                     [(125, 125)], dimension_numbers=dn)
    for blk in params["blocks"]:
        for j in range(2):
            w, b = blk[f"conv{j}_w"], blk[f"conv{j}_b"]
            h = jax.lax.conv_general_dilated(h, w, (1,), [(1, 1)], dimension_numbers=dn)
            h = h + b[None, :, None]
            scale = blk[f"bn{j}_gamma"] / jnp.sqrt(blk[f"bn{j}_var"] + EPS)
            h = (h - blk[f"bn{j}_mean"][None, :, None]) * scale[None, :, None] \
                + blk[f"bn{j}_beta"][None, :, None]
            h = jnp.maximum(h, 0.0)
        h = jax.lax.reduce_window(h, -jnp.inf, jax.lax.max,
                                  (1, 1, 3), (1, 1, 2), [(0, 0), (0, 0), (1, 1)])
    g = jnp.mean(h, axis=-1)                                   # (B, 512)
    g = jnp.maximum(g @ params["fc0_w"].T + params["fc0_b"], 0.0)
    g = jnp.maximum(g @ params["fc1_w"].T + params["fc1_b"], 0.0)
    logit = g @ params["fc2_w"].T + params["fc2_b"]
    return jax.nn.sigmoid(jnp.squeeze(logit, axis=-1))


# --------------------------- deterministic parameter init --------------------

def init_params(key):
    keys = iter(jax.random.split(key, 64))

    def nrm(shape, fan_in):
        return jax.random.normal(next(keys), shape, jnp.float32) / np.sqrt(fan_in)

    p = {"sinc_w": nrm((128, 1, 251), 251)}                    # Conv1d(1,128,k=251,bias=False)
    blocks = []
    for cin, cout in [(128, 128), (128, 256), (256, 512)]:
        blk = {}
        for j, (ci, co) in enumerate([(cin, cout), (cout, cout)]):
            blk[f"conv{j}_w"] = nrm((co, ci, 3), ci * 3)
            blk[f"conv{j}_b"] = nrm((co,), ci * 3)
            blk[f"bn{j}_gamma"] = 1.0 + 0.1 * jax.random.normal(next(keys), (co,), jnp.float32)
            blk[f"bn{j}_beta"] = 0.1 * jax.random.normal(next(keys), (co,), jnp.float32)
            blk[f"bn{j}_mean"] = 0.1 * jax.random.normal(next(keys), (co,), jnp.float32)
            blk[f"bn{j}_var"] = jax.random.uniform(next(keys), (co,), jnp.float32, 0.5, 1.5)
        blocks.append(blk)
    p["blocks"] = blocks
    for i, (din, dout) in enumerate([(512, 256), (256, 128), (128, 1)]):
        p[f"fc{i}_w"] = nrm((dout, din), din)                  # PyTorch Linear layout (out, in)
        p[f"fc{i}_b"] = nrm((dout,), din)
    return p


# --------------------------- main --------------------------------------------

if __name__ == "__main__":
    key = jax.random.PRNGKey(0)
    pkey, xkey = jax.random.split(key)
    params = init_params(pkey)

    B, L = 2, 512                                              # small waveform (B, samples)
    x = jax.random.normal(xkey, (B, L), jnp.float32)

    # Small tile sizes so the L-tiled / halo / accumulation code paths are
    # actually exercised at this toy length (defaults are the perf settings).
    out = jax.block_until_ready(rawnet2_forward(x, params, tm=32, tp=32, tg=16))
    ref = jax.block_until_ready(rawnet2_reference(x, params))

    assert out.shape == (B,), out.shape
    # bf16 activations/weights (f32 accumulation) vs pure-f32 reference.
    np.testing.assert_allclose(np.asarray(out), np.asarray(ref), rtol=4e-2, atol=4e-2)
    # TODO(synk): train-mode Dropout / BatchNorm batch-stat updates not modeled (inference).
    print("KERNEL_OK")
</pallas_src>

<mosaic_0001>
module attributes {stable_mosaic.version = 11 : i64} {
  func.func @_sinc_kernel(%arg0: i32, %arg1: i32, %arg2: memref<1x32x264xbf16, #tpu.memory_space<vmem>>, %arg3: memref<264x1024xbf16, #tpu.memory_space<vmem>>, %arg4: memref<1x32x1024xbf16, #tpu.memory_space<vmem>>) attributes {dimension_semantics = [#tpu.dimension_semantics<parallel>, #tpu.dimension_semantics<parallel>], iteration_bounds = array<i64: 2, 2>, scalar_prefetch = 0 : i64, scratch_operands = 0 : i64, tpu.core_type = #tpu.core_type<tc>, window_params = [{transform_indices = @transform_0, window_bounds = array<i64: 1, 32, 264>}, {pipeline_mode = #tpu.pipeline_mode<synchronous>, transform_indices = @transform_1, window_bounds = array<i64: 264, 1024>}, {transform_indices = @transform_2, window_bounds = array<i64: 1, 32, 1024>}]} {
    %c0 = arith.constant 0 : index
    %c0_0 = arith.constant 0 : index
    %c0_1 = arith.constant 0 : index
    %0 = vector.load %arg2[%c0, %c0_0, %c0_1] : memref<1x32x264xbf16, #tpu.memory_space<vmem>>, vector<1x32x264xbf16>
    %1 = vector.shape_cast %0 : vector<1x32x264xbf16> to vector<32x264xbf16>
    %c0_2 = arith.constant 0 : index
    %c0_3 = arith.constant 0 : index
    %2 = vector.load %arg3[%c0_2, %c0_3] : memref<264x1024xbf16, #tpu.memory_space<vmem>>, vector<264x1024xbf16>
    %cst = arith.constant dense<0.000000e+00> : vector<32x1024xf32>
    %3 = tpu.matmul %1, %2, %cst {dimension_numbers = #tpu.dot_dimension_numbers<[1], [0], [0], [1], [0, 0, 1, 1], [], []>} : vector<32x264xbf16>, vector<264x1024xbf16>, vector<32x1024xf32> -> vector<32x1024xf32>
    %4 = arith.truncf %3 : vector<32x1024xf32> to vector<32x1024xbf16>
    %c0_4 = arith.constant 0 : index
    %c0_5 = arith.constant 0 : index
    %c0_6 = arith.constant 0 : index
    %5 = vector.load %arg4[%c0_4, %c0_5, %c0_6] : memref<1x32x1024xbf16, #tpu.memory_space<vmem>>, vector<1x32x1024xbf16>
    %6 = vector.shape_cast %5 : vector<1x32x1024xbf16> to vector<32x1024xbf16>
    %7 = vector.shape_cast %4 : vector<32x1024xbf16> to vector<1x32x1024xbf16>
    tpu.vector_store %arg4[%c0_4, %c0_5, %c0_6], %7 {strides = array<i32>} : memref<1x32x1024xbf16, #tpu.memory_space<vmem>>, vector<1x32x1024xbf16>,
    return
  }
  func.func @transform_0(%arg0: i32, %arg1: i32) -> (i32, i32, i32) {
    %c0_i32 = arith.constant 0 : i32
    %c0_i32_0 = arith.constant 0 : i32
    return %arg0, %arg1, %c0_i32 : i32, i32, i32
  }
  func.func @transform_1(%arg0: i32, %arg1: i32) -> (i32, i32) {
    %c0_i32 = arith.constant 0 : i32
    %c0_i32_0 = arith.constant 0 : i32
    %c0_i32_1 = arith.constant 0 : i32
    return %c0_i32, %c0_i32_0 : i32, i32
  }
  func.func @transform_2(%arg0: i32, %arg1: i32) -> (i32, i32, i32) {
    %c0_i32 = arith.constant 0 : i32
    %c0_i32_0 = arith.constant 0 : i32
    return %arg0, %arg1, %c0_i32 : i32, i32, i32
  }
}

</mosaic_0001>

<bundles_post_ra>
// kernel: tpu_custom_call.1
= control target key start
LH: loop header
LB: loop body
LE: loop exit
PB: predicated region body
PF: predicated region fallthrough
CT: control target
= control target key end

     0   :  { %s2577_s0 = inlined_call_operand.hbm [shape: bf16[2,64,264], index: 0, kind: input, shape index: {}]   ;;  %s2578_s1 = inlined_call_operand.hbm [shape: bf16[264,1024], index: 1, kind: input, shape index: {}]   ;;  %s2579_s2 = inlined_call_operand.hbm [shape: bf16[2,64,1024], index: 2, kind: output, shape index: {}]  }
   0x1   :  { %2586 = sst [smem:[#allocation13_spill]] %s2578_s1 }
   0x2   :  { %7 = vsyncpa [#allocation3], 0 }
   0x3   :  { %9 = vsyncpa [#allocation3 + $0x1], 0 }
   0x4   :  { %10 = vsyncpa [#allocation6], 0 }
   0x5   :  { %11 = vsyncpa [#allocation4], 0 }
   0x6   :  { %13 = vsyncpa [#allocation4 + $0x1], 0  ;;  %s2254_s9 = smov 0   ;;  %s2256_s10 = smov 0  }
   0x7   :  { %s2258_s11 = smov 0   ;;  %s2260_s12 = smov 0  }
   0x8   :  { %s2262_s13 = smov 0   ;;  %s2264_s14 = smov 0  }
   0x9   :  { %s2266_s15 = smov 0   ;;  %s2268_s16 = smov 0  }
   0xa LB: > { %s1714_s17 = sadd.s32 4294967295, %s2227_s16   ;;  %s1715_s18 = sadd.s32 4294967294, %s2227_s16   ;;  %s2227_s16 = sphi %s2268_s16, %s19_s16   ;;  %s2223_s15 = sphi %s2266_s15, %s2611_s15   ;;  %s2219_s14 = sphi %s2264_s14, %s2610_s14   ;;  %s2215_s13 = sphi %s2262_s13, %s2609_s13   ;;  %s2211_s12 = sphi %s2260_s12, %s2608_s12   ;;  %s2207_s11 = sphi %s2258_s11, %s2607_s11   ;;  %s2203_s10 = sphi %s2256_s10, %s2606_s10   ;;  %s2199_s9 = sphi %s2254_s9, %s2605_s9  }
   0xb   : > { %p53_p0 = scmp.ne.s32.totalorder %s2203_s10, %s2199_s9  ;;  %p2298_p1 = scmp.eq.s32.totalorder %s1714_s17, 0 }
   0xc   : > { %p2302_p2 = scmp.eq.s32.totalorder %s1714_s17, 3  ;;  %p106_p3 = scmp.eq.s32.totalorder %s1715_s18, 3 }
   0xd   : > { %s2587_s19 = scalar_select %p2298_p1, 1, 0 }
   0xe   : > { %s2588_s20 = scalar_select %p2302_p2, 1, 0 }
   0xf   : > { %p2308_p4 = por %p2298_p1, %p53_p0  ;;  %p1716_p5 = scmp.ge.s32.totalorder %s2227_s16, 1 }
  0x10   : > { %p2313_p6 = por %p106_p3, %p53_p0  ;;  %p113_p7 = scmp.lt.s32.totalorder %s2227_s16, 5 }
  0x11   : > { %s2589_s21 = scalar_select %p2308_p4, 1, 0 }
  0x12   : > { %s2590_s22 = scalar_select %p2313_p6, 1, 0 }
  0x13   : > { %p2318_p8 = pnand %p1716_p5, %p113_p7  ;;  %s2229_s24 = smov [#allocation5]  }
  0x14   : > { %s125_s25 = sshll.u32 %s2229_s24, 4  ;;  %s2593_s1 = sld [smem:[#allocation13_spill]]  ;;  %s126_s25 = int_to_ptr.vmem [resolvable:$true] %s125_s25 }
  0x15   : > { %s2591_s23 = scalar_select %p2318_p8, 1, 0 }
  0x16   : > { %p1963_p9 = pneg %p2318_p8 }
  0x18   : > { %p2326_p10 = pnand %p1963_p9, %p2298_p1 }
  0x1a   : > { %s2067_s29 = scalar_lea.hbm %s2593_s1, 16896  ;;  %p2069_p12 = pneg %p2326_p10 }
  0x1b   : > { %p2068_p11 = scmp.ne.s32.totalorder %s2593_s1, %s2067_s29  ;;  %p2074_p3 = scmp.lt.u32.totalorder %s2067_s29, %s2593_s1 }
  0x1d   : > { %p2070_p13 = pnand %p2069_p12, %p2068_p11 }
  0x1f   : > { %p2071_p0 = pneg %p2070_p13 }
  0x21   : > { %p2076_p5 = pnand %p2074_p3, %p2071_p0 }
  0x23   : > { %2079 = shalt.err (!%p2076_p5)
}
  0x24   : > { %s2080_s6 = scalar_lea.vmem %s126_s25, 16896  ;;  %p2088_p1 = scmp.lt.s32.totalorder %s126_s25, %s126_s25 }
  0x25   : > { %p2081_p7 = scmp.ne.s32.totalorder %s126_s25, %s2080_s6  ;;  %p2089_p4 = scmp.lt.s32.totalorder %s2080_s6, %s2080_s6 }
  0x27   : > { %p2083_p9 = pnand %p2081_p7, %p2069_p12  ;;  %p2090_p8 = por %p2089_p4, %p2088_p1 }
  0x29   : > { %p2084_p6 = pneg %p2083_p9 }
  0x2b   : > { %p2091_p2 = pnand %p2090_p8, %p2084_p6 }
  0x2d   : > { %2094 = shalt.err (!%p2091_p2)
}
  0x2e   : > { %s2230_s7 = smov 512   ;;  %s2231_s8 = smov 32  }
  0x2f   : > { %1966 = dma.hbm_to_vmem [thread:$0]  (!%p2326_p10), %s2593_s1, 16896, %s126_s25, [#allocation6], %s2230_s7, %s2230_s7, %s2231_s8  }
  0x30   : > { %s28_s24 = sadd.s32 1, %s2219_s14  ;;  %s31_s27 = sadd.s32 1, %s2223_s15 }
  0x31   : > { %p29_p1 = scmp.ge.s32.totalorder %s28_s24, 2  ;;  %s40_s28 = sadd.s32 1, %s2207_s11 }
  0x32   : > { %p47_p2 = scmp.ne.s32.totalorder %s2207_s11, %s2203_s10  ;;  %p48_p4 = scmp.eq.s32.totalorder %s2227_s16, 0 }
  0x33   : > { %s2613_s24 = smov (%p29_p1, %s28_s24), 0  ;;  %s2615_s27 = smov (!%p29_p1, %s31_s27), %s2223_s15 }
  0x34   : > { %2594 = sst [smem:[#allocation11_spill]] %s2613_s24  ;;  %s36_s29 = ssub.s32 %s2219_s14, %s2613_s24 }
  0x35   : > { %p33_p6 = scmp.ge.s32.totalorder %s2615_s27, 2  ;;  %p2595_p8 = scmp.ne.s32.totalorder %s2588_s20, 0 }
  0x36   : > { %p49_p10 = por %p48_p4, %p47_p2  ;;  %p1976_p12 = scmp.lt.s32.totalorder %s2227_s16, 4 }
  0x37   : > { %p2359_p11 = por %p2595_p8, %p47_p2  ;;  %s2617_s27 = smov (%p33_p6, %s2615_s27), 0 }
  0x38   : > { %2597 = sst [smem:[#allocation12_spill]] %s2617_s27  ;;  %s139_s25 = sand.u32 1, %s2207_s11  }
  0x39   : > { %s1952_s30 = smul.u32 12, %s2219_s14  ;;  %s35_s3 = ssub.s32 %s2223_s15, %s2617_s27 }
  0x3a   : > { %s37_s4 = sor.u32 %s36_s29, %s35_s3  ;;  %s1951_s5 = smul.u32 48, %s139_s25 }
  0x3b   : > { %p38_p13 = scmp.eq.s32.totalorder %s37_s4, 0  ;;  %s1953_s6 = smul.u32 24, %s2223_s15 }
  0x3c   : > { %p2371_p0 = pnand %p1976_p12, %p49_p10  ;;  %s143_s17 = scalar_lea.vmem [#allocation2], %s1951_s5 }
  0x3d   : > { %s2376_s20 = scalar_select %p38_p13, %s2207_s11, %s40_s28  }
  0x3e   : > { %s150_s8 = sadd.s32 %s1953_s6, %s1952_s30  ;;  %s153_s18 = sshll.u32 %s143_s17, 4  ;;  %s2378_s18 = int_to_ptr.vmem [resolvable:$true] %s153_s18 }
  0x3f   : > { %s1721_s1 = sshll.u32 %s150_s8, 6  ;;  %s2385_s3 = scalar_lea.sflag [#allocation3], %s139_s25 }
  0x40   : > { %s2383_s29 = scalar_lea.hbm %s2577_s0, %s1721_s1  ;;  %p2097_p5 = pneg %p2371_p0 }
  0x41   : > { %s2095_s4 = scalar_lea.hbm %s2383_s29, 768  ;;  %s2100_s24 = scalar_lea.hbm %s2577_s0, 3072 }
  0x42   : > { %p2096_p3 = scmp.ne.s32.totalorder %s2383_s29, %s2095_s4  ;;  %p2101_p1 = scmp.lt.u32.totalorder %s2383_s29, %s2577_s0 }
  0x43   : > { %p2102_p2 = scmp.lt.u32.totalorder %s2100_s24, %s2095_s4  ;;  %p2104_p6 = scmp.lt.u32.totalorder %s2095_s4, %s2383_s29 }
  0x44   : > { %p2098_p7 = pnand %p2097_p5, %p2096_p3 }
  0x45   : > { %p2103_p4 = por %p2102_p2, %p2101_p1 }
  0x46   : > { %p2099_p9 = pneg %p2098_p7 }
  0x47   : > { %p2105_p8 = por %p2104_p6, %p2103_p4 }
  0x49   : > { %p2106_p10 = pnand %p2105_p8, %p2099_p9 }
  0x4b   : > { %2109 = shalt.err (!%p2106_p10)
}
  0x4c   : > { %s2110_s25 = scalar_lea.vmem %s2378_s18, 768  ;;  %s2232_s5 = smov [#allocation2]  }
  0x4d   : > { %p2111_p12 = scmp.ne.s32.totalorder %s2378_s18, %s2110_s25  ;;  %s2115_s6 = sshll.u32 %s2232_s5, 4  ;;  %s2116_s6 = int_to_ptr.vmem [resolvable:$false] %s2115_s6 }
  0x4e   : > { %s2117_s8 = scalar_lea.vmem %s2116_s6, 1536  ;;  %p2118_p7 = scmp.lt.s32.totalorder %s2378_s18, %s2116_s6 }
  0x4f   : > { %p2113_p13 = pnand %p2111_p12, %p2097_p5  ;;  %p2119_p1 = scmp.lt.s32.totalorder %s2117_s8, %s2110_s25 }
  0x51   : > { %p2114_p3 = pneg %p2113_p13  ;;  %p2120_p2 = por %p2119_p1, %p2118_p7 }
  0x53   : > { %p2121_p4 = pnand %p2120_p2, %p2114_p3 }
  0x55   : > { %2124 = shalt.err (!%p2121_p4)
}
  0x56   : > { %s2233_s17 = smov 192   ;;  %s2234_s4 = smov 12  }
  0x57   : > { %1970 = dma.hbm_to_vmem [thread:$0]  (!%p2371_p0), %s2383_s29, 768, %s2378_s18, %s2385_s3, %s2233_s17, %s2233_s17, %s2234_s4  }
  0x58   : > { %p2599_p5 = scmp.ne.s32.totalorder %s2591_s23, 0 }
  0x59   : > { %s2416_s28 = sand.u32 (!%p2599_p5), 1, %s2203_s10   ;;  %p2600_p9 = scmp.ne.s32.totalorder (!%p2599_p5), %s2589_s21, 0 }
  0x5a   : > { %165 = sbr.rel (%p2599_p5) target bundleno = 505 (0x1f9), region = 28  ;;  %s168_s24 = scalar_lea.sflag (!%p2599_p5), [#allocation3], %s2416_s28 }
  0x5b   : > { %s1954_s30 = smul.u32 (!%p2599_p5), 48, %s2416_s28 }
  0x5d   : > { %s2420_s1 = scalar_lea.vmem (!%p2599_p5), [#allocation2], %s1954_s30 }
  0x61   : > { %2186 = dma.done.wait (%p2600_p9), %s168_s24, 768  }
  0x62   : > { %2188 = vsyncadd (%p2600_p9), %s168_s24, 4294966528  ;;  %p2601_p0 = scmp.ne.s32.totalorder %s2587_s19, 0 }
  0x64   : > { %2190 = dma.done.wait (%p2601_p0), [#allocation6], 16896  }
  0x65   : > { %2192 = vsyncadd (%p2601_p0), [#allocation6], 4294950400  ;;  %v207_v0 = vld [vmem:[#allocation5] sm:$0xff]  ;;  %v208_v2 = vld [vmem:[#allocation5 + $0x8] sm:$0xff]  ;;  %vm1036_vm0 = vcmask 1043456   ;;  %vm1029_vm1 = vcmask 64512  }
  0x66   : > { %v211_v1 = vld [vmem:[#allocation5 + $0x20] sm:$0xff]  ;;  %v212_v4 = vld [vmem:[#allocation5 + $0x28] sm:$0xff]  ;;  %s1724_s19 = sshll.u32 %s2416_s28, 7  ;;  %s1918_s23 = sshll.u32 %s2211_s12, 5 }
  0x67   : > { %v1732_v3 = vcombine.high %v207_v0, %v211_v1  ;;  %v1731_v5 = vcombine.low %v207_v0, %v211_v1  ;;  %v215_v6 = vld [vmem:[#allocation5 + $0x40] sm:$0xff]  ;;  %v1734_v8 = vcombine.high %v208_v2, %v212_v4  ;;  %v1733_v9 = vcombine.low %v208_v2, %v212_v4  ;;  %v216_v11 = vld [vmem:[#allocation5 + $0x48] sm:$0xff]  ;;  %s2497_s21 = scalar_lea.vmem [#allocation7], %s1724_s19  ;;  %s1898_s7 = sshll.u32 %s2215_s13, 6 }
  0x68   : > { %v219_v7 = vld [vmem:[#allocation5 + $0x60] sm:$0xff]  ;;  %v220_v12 = vld [vmem:[#allocation5 + $0x68] sm:$0xff]  ;;  %s1611_s18 = sadd.s32 %s1918_s23, %s1898_s7  ;;  %s1614_s3 = sshll.u32 %s2497_s21, 4  ;;  %s2520_s3 = int_to_ptr.vmem [resolvable:$true] %s1614_s3 }
  0x69   : > { %v1740_v10 = vcombine.high %v215_v6, %v219_v7  ;;  %v223_v13 = vld [vmem:[#allocation5 + $0x80] sm:$0xff]  ;;  %1061 = vmatprep.subr.bf16.mxu0 %v1732_v3  ;;  %v1742_v14 = vcombine.high %v216_v11, %v220_v12  ;;  %v224_v16 = vld [vmem:[#allocation5 + $0x88] sm:$0xff]  ;;  %1167 = vmatprep.subr.bf16.mxu1 %v1734_v8  ;;  %v1739_v18 = vcombine.low %v215_v6, %v219_v7  ;;  %s1899_s29 = sshll.u32 %s1611_s18, 6  ;;  %s1598_s25 = scalar_lea.sflag [#allocation4], %s2416_s28 }
  0x6a   : > { %v227_v15 = vld [vmem:[#allocation5 + $0xa0] sm:$0xff]  ;;  %v228_v17 = vld [vmem:[#allocation5 + $0xa8] sm:$0xff]  ;;  %1062 = vmatpush1.bf16.msra.mxu0 %v1731_v5  ;;  %1168 = vmatpush1.bf16.msra.mxu1 %v1733_v9  ;;  %v1741_v19 = vcombine.low %v216_v11, %v220_v12  ;;  %s2518_s27 = scalar_lea.hbm %s2579_s2, %s1899_s29  ;;  %s2125_s5 = scalar_lea.vmem %s2520_s3, 2048 }
  0x6b   : > { %1063 = vmatprep.subr.bf16.mxu0 %v1740_v10  ;;  %v1748_v20 = vcombine.high %v223_v13, %v227_v15  ;;  %1169 = vmatprep.subr.bf16.mxu1 %v1742_v14  ;;  %v1750_v21 = vcombine.high %v224_v16, %v228_v17  ;;  %v231_v22 = vld [vmem:[#allocation5 + $0xc0] sm:$0xff]  ;;  %v232_v24 = vld [vmem:[#allocation5 + $0xc8] sm:$0xff]  ;;  %v1747_v26 = vcombine.low %v223_v13, %v227_v15  ;;  %p2126_p6 = scmp.ne.s32.totalorder %s2520_s3, %s2125_s5  ;;  %s2236_s6 = smov [#allocation7]  }
  0x6c   : > { %v235_v23 = vld [vmem:[#allocation5 + $0xe0] sm:$0xff]  ;;  %v236_v25 = vld [vmem:[#allocation5 + $0xe8] sm:$0xff]  ;;  %v1749_v27 = vcombine.low %v224_v16, %v228_v17  ;;  %s2129_s8 = sshll.u32 %s2236_s6, 4  ;;  %s2130_s8 = int_to_ptr.vmem [resolvable:$false] %s2129_s8 }
  0x6d   : > { %v1756_v28 = vcombine.high %v231_v22, %v235_v23  ;;  %v1758_v29 = vcombine.high %v232_v24, %v236_v25  ;;  %v239_v30 = vld [vmem:[#allocation5 + $0x100] sm:$0xff]  ;;  %v240_v32 = vld [vmem:[#allocation5 + $0x108] sm:$0xff]  ;;  %v1755_v34 = vcombine.low %v231_v22, %v235_v23  ;;  %v1757_v35 = vcombine.low %v232_v24, %v236_v25  ;;  %p2127_p8 = pnand %p2126_p6, %p2359_p11  ;;  %s2131_s17 = scalar_lea.vmem %s2130_s8, 4096 }
  0x6e   : > { %1064 = vmatpush1.bf16.msra.mxu0 %v1739_v18  ;;  %1170 = vmatpush1.bf16.msra.mxu1 %v1741_v19  ;;  %v243_v31 = vld [vmem:[#allocation5 + $0x120] sm:$0xff]  ;;  %v244_v33 = vld [vmem:[#allocation5 + $0x128] sm:$0xff]  ;;  %p2132_p12 = scmp.lt.s32.totalorder %s2520_s3, %s2130_s8  ;;  %p2133_p13 = scmp.lt.s32.totalorder %s2131_s17, %s2125_s5 }
  0x6f   : > { %1065 = vmatprep.subr.bf16.mxu0 %v1748_v20  ;;  %1171 = vmatprep.subr.bf16.mxu1 %v1750_v21  ;;  %v1764_v36 = vcombine.high %v239_v30, %v243_v31  ;;  %v1766_v37 = vcombine.high %v240_v32, %v244_v33  ;;  %v247_v38 = vld [vmem:[#allocation5 + $0x140] sm:$0xff]  ;;  %v248_v40 = vld [vmem:[#allocation5 + $0x148] sm:$0xff]  ;;  %v1763_v42 = vcombine.low %v239_v30, %v243_v31  ;;  %p2128_p10 = pneg %p2127_p8 }
  0x70   : > { %v251_v39 = vld [vmem:[#allocation5 + $0x160] sm:$0xff]  ;;  %v252_v41 = vld [vmem:[#allocation5 + $0x168] sm:$0xff]  ;;  %v1765_v43 = vcombine.low %v240_v32, %v244_v33  ;;  %p2134_p3 = por %p2133_p13, %p2132_p12 }
  0x71   : > { %v1772_v44 = vcombine.high %v247_v38, %v251_v39  ;;  %v1774_v45 = vcombine.high %v248_v40, %v252_v41  ;;  %v255_v46 = vld [vmem:[#allocation5 + $0x180] sm:$0xff]  ;;  %v256_v48 = vld [vmem:[#allocation5 + $0x188] sm:$0xff]  ;;  %v1771_v50 = vcombine.low %v247_v38, %v251_v39  ;;  %v1773_v51 = vcombine.low %v248_v40, %v252_v41 }
  0x72   : > { %1066 = vmatpush1.bf16.msra.mxu0 %v1747_v26  ;;  %1172 = vmatpush1.bf16.msra.mxu1 %v1749_v27  ;;  %v259_v47 = vld [vmem:[#allocation5 + $0x1a0] sm:$0xff]  ;;  %v260_v49 = vld [vmem:[#allocation5 + $0x1a8] sm:$0xff]  ;;  %p2135_p7 = pnand %p2134_p3, %p2128_p10 }
  0x73   : > { %1067 = vmatprep.subr.bf16.mxu0 %v1756_v28  ;;  %1173 = vmatprep.subr.bf16.mxu1 %v1758_v29  ;;  %v1780_v52 = vcombine.high %v255_v46, %v259_v47  ;;  %v263_v53 = vld [vmem:[#allocation5 + $0x1c0] sm:$0xff]  ;;  %v1782_v54 = vcombine.high %v256_v48, %v260_v49  ;;  %v264_v56 = vld [vmem:[#allocation5 + $0x1c8] sm:$0xff]  ;;  %v1779_v59 = vcombine.low %v255_v46, %v259_v47 }
  0x74   : > { %v267_v55 = vld [vmem:[#allocation5 + $0x1e0] sm:$0xff]  ;;  %v268_v58 = vld [vmem:[#allocation5 + $0x1e8] sm:$0xff]  ;;  %v1781_v60 = vcombine.low %v256_v48, %v260_v49 }
  0x75   : > { %v2431_v57 = vld [vmem:[%s2420_s1 + $0x4] ss:$12 sps:$4 sm:$0xff]   ;;  %v1788_v61 = vcombine.high %v263_v53, %v267_v55  ;;  %v1790_v63 = vcombine.high %v264_v56, %v268_v58  ;;  %v272_v1 = vld [vmem:[#allocation5 + $0x208] sm:$0xff]  ;;  %v1787_v3 = vcombine.low %v263_v53, %v267_v55  ;;  %v1789_v4 = vcombine.low %v264_v56, %v268_v58 }
  0x76   : > { %1068 = vmatpush1.bf16.msra.mxu0 %v1755_v34  ;;  %1174 = vmatpush1.bf16.msra.mxu1 %v1757_v35  ;;  %v271_v62 = vld [vmem:[#allocation5 + $0x200] sm:$0xff]  ;;  %v276_v2 = vld [vmem:[#allocation5 + $0x228] sm:$0xff] }
  0x77   : > { %1069 = vmatprep.subr.bf16.mxu0 %v1764_v36  ;;  %1175 = vmatprep.subr.bf16.mxu1 %v1766_v37  ;;  %v275_v0 = vld [vmem:[#allocation5 + $0x220] sm:$0xff]  ;;  %v1798_v6 = vcombine.high %v272_v1, %v276_v2  ;;  %v280_v9 = vld [vmem:[#allocation5 + $0x248] sm:$0xff]  ;;  %v1797_v12 = vcombine.low %v272_v1, %v276_v2 }
  0x78   : > { %1093 = vmatprep.mubr.bf16.mxu0 %v2431_v57  ;;  %1199 = vmatprep.mubr.bf16.mxu1 %v2431_v57  ;;  %v1796_v5 = vcombine.high %v271_v62, %v275_v0  ;;  %v279_v7 = vld [vmem:[#allocation5 + $0x240] sm:$0xff]  ;;  %v284_v10 = vld [vmem:[#allocation5 + $0x268] sm:$0xff]  ;;  %v1795_v11 = vcombine.low %v271_v62, %v275_v0 }
  0x79   : > { %v283_v8 = vld [vmem:[#allocation5 + $0x260] sm:$0xff]  ;;  %v1806_v14 = vcombine.high %v280_v9, %v284_v10  ;;  %v288_v17 = vld [vmem:[#allocation5 + $0x288] sm:$0xff]  ;;  %v1805_v20 = vcombine.low %v280_v9, %v284_v10  ;;  %v209_v9 = vld [vmem:[#allocation5 + $0x10] sm:$0xff] }
  0x7a   : > { %1070 = vmatpush1.bf16.msra.mxu0 %v1763_v42  ;;  %1176 = vmatpush1.bf16.msra.mxu1 %v1765_v43  ;;  %v1804_v13 = vcombine.high %v279_v7, %v283_v8  ;;  %v287_v15 = vld [vmem:[#allocation5 + $0x280] sm:$0xff]  ;;  %v292_v18 = vld [vmem:[#allocation5 + $0x2a8] sm:$0xff]  ;;  %v1803_v19 = vcombine.low %v279_v7, %v283_v8  ;;  %v213_v10 = vld [vmem:[#allocation5 + $0x30] sm:$0xff] }
  0x7b   : > { %1071 = vmatprep.subr.bf16.mxu0 %v1772_v44  ;;  %1177 = vmatprep.subr.bf16.mxu1 %v1774_v45  ;;  %v291_v16 = vld [vmem:[#allocation5 + $0x2a0] sm:$0xff]  ;;  %v1814_v22 = vcombine.high %v288_v17, %v292_v18  ;;  %v296_v25 = vld [vmem:[#allocation5 + $0x2c8] sm:$0xff]  ;;  %v1813_v28 = vcombine.low %v288_v17, %v292_v18 }
  0x7c   : > { %v1812_v21 = vcombine.high %v287_v15, %v291_v16  ;;  %v295_v23 = vld [vmem:[#allocation5 + $0x2c0] sm:$0xff]  ;;  %v300_v26 = vld [vmem:[#allocation5 + $0x2e8] sm:$0xff]  ;;  %v1811_v27 = vcombine.low %v287_v15, %v291_v16  ;;  %v1736_v16 = vcombine.high %v209_v9, %v213_v10 }
  0x7d   : > { %v299_v24 = vld [vmem:[#allocation5 + $0x2e0] sm:$0xff]  ;;  %v1822_v30 = vcombine.high %v296_v25, %v300_v26  ;;  %v304_v33 = vld [vmem:[#allocation5 + $0x308] sm:$0xff]  ;;  %v1821_v36 = vcombine.low %v296_v25, %v300_v26  ;;  %v1735_v25 = vcombine.low %v209_v9, %v213_v10  ;;  %v266_v9 = vld [vmem:[#allocation5 + $0x1d8] sm:$0xff] }
  0x7e   : > { %1072 = vmatpush1.bf16.msra.mxu0 %v1771_v50  ;;  %1178 = vmatpush1.bf16.msra.mxu1 %v1773_v51  ;;  %v1820_v29 = vcombine.high %v295_v23, %v299_v24  ;;  %v303_v31 = vld [vmem:[#allocation5 + $0x300] sm:$0xff]  ;;  %v308_v34 = vld [vmem:[#allocation5 + $0x328] sm:$0xff]  ;;  %v1819_v35 = vcombine.low %v295_v23, %v299_v24  ;;  %v218_v23 = vld [vmem:[#allocation5 + $0x58] sm:$0xff] }
  0x7f   : > { %1073 = vmatprep.subr.bf16.mxu0 %v1780_v52  ;;  %1179 = vmatprep.subr.bf16.mxu1 %v1782_v54  ;;  %v307_v32 = vld [vmem:[#allocation5 + $0x320] sm:$0xff]  ;;  %v1830_v38 = vcombine.high %v304_v33, %v308_v34  ;;  %v312_v41 = vld [vmem:[#allocation5 + $0x348] sm:$0xff]  ;;  %v1829_v44 = vcombine.low %v304_v33, %v308_v34  ;;  %v222_v24 = vld [vmem:[#allocation5 + $0x78] sm:$0xff] }
  0x80   : > { %v1828_v37 = vcombine.high %v303_v31, %v307_v32  ;;  %v311_v39 = vld [vmem:[#allocation5 + $0x340] sm:$0xff]  ;;  %v316_v42 = vld [vmem:[#allocation5 + $0x368] sm:$0xff]  ;;  %v1827_v43 = vcombine.low %v303_v31, %v307_v32  ;;  %v226_v31 = vld [vmem:[#allocation5 + $0x98] sm:$0xff]  ;;  %v1745_v34 = vcombine.low %v218_v23, %v222_v24 }
  0x81   : > { %v315_v40 = vld [vmem:[#allocation5 + $0x360] sm:$0xff]  ;;  %v1838_v46 = vcombine.high %v312_v41, %v316_v42  ;;  %v320_v49 = vld [vmem:[#allocation5 + $0x388] sm:$0xff]  ;;  %v1837_v52 = vcombine.low %v312_v41, %v316_v42  ;;  %v230_v32 = vld [vmem:[#allocation5 + $0xb8] sm:$0xff] }
  0x82   : > { %1074 = vmatpush1.bf16.msra.mxu0 %v1779_v59  ;;  %1180 = vmatpush1.bf16.msra.mxu1 %v1781_v60  ;;  %v1836_v45 = vcombine.high %v311_v39, %v315_v40  ;;  %v319_v47 = vld [vmem:[#allocation5 + $0x380] sm:$0xff]  ;;  %v324_v50 = vld [vmem:[#allocation5 + $0x3a8] sm:$0xff]  ;;  %v1835_v51 = vcombine.low %v311_v39, %v315_v40  ;;  %v234_v40 = vld [vmem:[#allocation5 + $0xd8] sm:$0xff] }
  0x83   : > { %1075 = vmatprep.subr.bf16.mxu0 %v1788_v61  ;;  %1181 = vmatprep.subr.bf16.mxu1 %v1790_v63  ;;  %v323_v48 = vld [vmem:[#allocation5 + $0x3a0] sm:$0xff]  ;;  %v1846_v54 = vcombine.high %v320_v49, %v324_v50  ;;  %v328_v58 = vld [vmem:[#allocation5 + $0x3c8] sm:$0xff]  ;;  %v1845_v61 = vcombine.low %v320_v49, %v324_v50  ;;  %v238_v41 = vld [vmem:[#allocation5 + $0xf8] sm:$0xff] }
  0x84   : > { %v1844_v53 = vcombine.high %v319_v47, %v323_v48  ;;  %v327_v55 = vld [vmem:[#allocation5 + $0x3c0] sm:$0xff]  ;;  %v332_v59 = vld [vmem:[#allocation5 + $0x3e8] sm:$0xff]  ;;  %v1843_v60 = vcombine.low %v319_v47, %v323_v48  ;;  %v245_v47 = vld [vmem:[#allocation5 + $0x130] sm:$0xff] }
  0x85   : > { %v331_v56 = vld [vmem:[#allocation5 + $0x3e0] sm:$0xff]  ;;  %v1854_v63 = vcombine.high %v328_v58, %v332_v59  ;;  %v336_v1 = vld [vmem:[#allocation5 + $0x408] sm:$0xff]  ;;  %v242_v48 = vld [vmem:[#allocation5 + $0x118] sm:$0xff] }
  0x86   : > { %1076 = vmatpush1.bf16.msra.mxu0 %v1787_v3  ;;  %1182 = vmatpush1.bf16.msra.mxu1 %v1789_v4  ;;  %v1852_v62 = vcombine.high %v327_v55, %v331_v56  ;;  %v335_v0 = vld [vmem:[#allocation5 + $0x400] sm:$0xff]  ;;  %v1851_v2 = vcombine.low %v327_v55, %v331_v56  ;;  %v1853_v3 = vcombine.low %v328_v58, %v332_v59  ;;  %v246_v49 = vld [vmem:[#allocation5 + $0x138] sm:$0xff]  ;;  %v253_v55 = vld [vmem:[#allocation5 + $0x170] sm:$0xff] }
  0x87   : > { %1077 = vmatprep.subr.bf16.mxu0 %v1796_v5  ;;  %1183 = vmatprep.subr.bf16.mxu1 %v1798_v6  ;;  %v1860_v4 = vcombine.high %v335_v0, %v335_v0  ;;  %v1859_v5 = vcombine.low %v335_v0, %v335_v0  ;;  %v1862_v6 = vcombine.high %v336_v1, %v336_v1  ;;  %v2436_v8 = vld [vmem:[%s2420_s1] ss:$12 sps:$4 sm:$0xff]   ;;  %v2450_v18 = vld [vmem:[%s2420_s1 + $0x18] ss:$12 sps:$4 sm:$0xff]  }
  0x88   : > { %v1861_v7 = vcombine.low %v336_v1, %v336_v1  ;;  %v2466_v39 = vld [vmem:[%s2420_s1 + $0x20] ss:$12 sps:$4 sm:$0xff]  }
  0x89   : > { %v250_v56 = vld [vmem:[#allocation5 + $0x158] sm:$0xff]  ;;  %v261_v0 = vld [vmem:[#allocation5 + $0x1b0] sm:$0xff] }
  0x8a   : > { %1078 = vmatpush1.bf16.msra.mxu0 %v1795_v11  ;;  %1184 = vmatpush1.bf16.msra.mxu1 %v1797_v12  ;;  %v210_v11 = vld [vmem:[#allocation5 + $0x18] sm:$0xff]  ;;  %v1044_v15 = vsel %vm1036_vm0, %v1861_v7, 0  ;;  %v269_v7 = vld [vmem:[#allocation5 + $0x1f0] sm:$0xff] }
  0x8b   : > { %1079 = vmatprep.subr.bf16.mxu0 %v1804_v13  ;;  %1185 = vmatprep.subr.bf16.mxu1 %v1806_v14  ;;  %v214_v12 = vld [vmem:[#allocation5 + $0x38] sm:$0xff]  ;;  %v1038_v13 = vsel %vm1036_vm0, %v1859_v5, 0 }
  0x8c   : > { %v2441_v14 = vld [vmem:[%s2420_s1 + $0x1c] ss:$12 sps:$4 sm:$0xff]   ;;  %v1738_v17 = vcombine.high %v210_v11, %v214_v12  ;;  %v1737_v26 = vcombine.low %v210_v11, %v214_v12 }
  0x8d   : > { %v254_v58 = vld [vmem:[#allocation5 + $0x178] sm:$0xff] }
  0x8e   : > { %1080 = vmatpush1.bf16.msra.mxu0 %v1803_v19  ;;  %1186 = vmatpush1.bf16.msra.mxu1 %v1805_v20  ;;  %v2235_v19 = vmov 0   ;;  %v217_v20 = vld [vmem:[#allocation5 + $0x50] sm:$0xff]  ;;  %v258_v1 = vld [vmem:[#allocation5 + $0x198] sm:$0xff] }
  0x8f   : > { %1081 = vmatprep.subr.bf16.mxu0 %v1812_v21  ;;  %1187 = vmatprep.subr.bf16.mxu1 %v1814_v22  ;;  %v221_v21 = vld [vmem:[#allocation5 + $0x70] sm:$0xff]  ;;  %v270_v10 = vld [vmem:[#allocation5 + $0x1f8] sm:$0xff] }
  0x90   : > { %v2457_v22 = vld [vmem:[%s2420_s1 + $0x8] ss:$12 sps:$4 sm:$0xff]   ;;  %v1743_v33 = vcombine.low %v217_v20, %v221_v21 }
  0x92   : > { %1082 = vmatpush1.bf16.msra.mxu0 %v1811_v27  ;;  %1188 = vmatpush1.bf16.msra.mxu1 %v1813_v28  ;;  %v1744_v27 = vcombine.high %v217_v20, %v221_v21  ;;  %v1746_v28 = vcombine.high %v218_v23, %v222_v24  ;;  %v274_v20 = vld [vmem:[#allocation5 + $0x218] sm:$0xff]  ;;  %v1793_v24 = vcombine.low %v266_v9, %v270_v10 }
  0x93   : > { %1083 = vmatprep.subr.bf16.mxu0 %v1820_v29  ;;  %1189 = vmatprep.subr.bf16.mxu1 %v1822_v30  ;;  %v225_v29 = vld [vmem:[#allocation5 + $0x90] sm:$0xff]  ;;  %v278_v21 = vld [vmem:[#allocation5 + $0x238] sm:$0xff] }
  0x94   : > { %v229_v30 = vld [vmem:[#allocation5 + $0xb0] sm:$0xff] }
  0x95   : > { %v1751_v42 = vcombine.low %v225_v29, %v229_v30 }
  0x96   : > { %1084 = vmatpush1.bf16.msra.mxu0 %v1819_v35  ;;  %1190 = vmatpush1.bf16.msra.mxu1 %v1821_v36  ;;  %v1752_v35 = vcombine.high %v225_v29, %v229_v30  ;;  %v1754_v36 = vcombine.high %v226_v31, %v230_v32  ;;  %v282_v29 = vld [vmem:[#allocation5 + $0x258] sm:$0xff] }
  0x97   : > { %1085 = vmatprep.subr.bf16.mxu0 %v1828_v37  ;;  %1191 = vmatprep.subr.bf16.mxu1 %v1830_v38  ;;  %v233_v37 = vld [vmem:[#allocation5 + $0xd0] sm:$0xff]  ;;  %v286_v30 = vld [vmem:[#allocation5 + $0x278] sm:$0xff] }
  0x98   : > { %v237_v38 = vld [vmem:[#allocation5 + $0xf0] sm:$0xff] }
  0x99   : > { %v1759_v50 = vcombine.low %v233_v37, %v237_v38 }
  0x9a   : > { %1086 = vmatpush1.bf16.msra.mxu0 %v1827_v43  ;;  %1192 = vmatpush1.bf16.msra.mxu1 %v1829_v44  ;;  %v1753_v43 = vcombine.low %v226_v31, %v230_v32  ;;  %v1760_v44 = vcombine.high %v233_v37, %v237_v38  ;;  %v1801_v32 = vcombine.low %v274_v20, %v278_v21  ;;  %v290_v37 = vld [vmem:[#allocation5 + $0x298] sm:$0xff] }
  0x9b   : > { %1087 = vmatprep.subr.bf16.mxu0 %v1836_v45  ;;  %1193 = vmatprep.subr.bf16.mxu1 %v1838_v46  ;;  %v1762_v45 = vcombine.high %v234_v40, %v238_v41  ;;  %v241_v46 = vld [vmem:[#allocation5 + $0x110] sm:$0xff]  ;;  %v294_v38 = vld [vmem:[#allocation5 + $0x2b8] sm:$0xff] }
  0x9c   : > { %v1767_v59 = vcombine.low %v241_v46, %v245_v47 }
  0x9e   : > { %1088 = vmatpush1.bf16.msra.mxu0 %v1835_v51  ;;  %1194 = vmatpush1.bf16.msra.mxu1 %v1837_v52  ;;  %v1761_v51 = vcombine.low %v234_v40, %v238_v41  ;;  %v1768_v52 = vcombine.high %v241_v46, %v245_v47  ;;  %v1809_v41 = vcombine.low %v282_v29, %v286_v30  ;;  %v298_v46 = vld [vmem:[#allocation5 + $0x2d8] sm:$0xff] }
  0x9f   : > { %1089 = vmatprep.subr.bf16.mxu0 %v1844_v53  ;;  %1195 = vmatprep.subr.bf16.mxu1 %v1846_v54  ;;  %v1770_v53 = vcombine.high %v242_v48, %v246_v49  ;;  %v249_v54 = vld [vmem:[#allocation5 + $0x150] sm:$0xff]  ;;  %v302_v47 = vld [vmem:[#allocation5 + $0x2f8] sm:$0xff] }
  0xa2   : > { %1090 = vmatpush1.bf16.msra.mxu0 %v1843_v60  ;;  %1196 = vmatpush1.bf16.msra.mxu1 %v1845_v61  ;;  %v1769_v60 = vcombine.low %v242_v48, %v246_v49  ;;  %v1776_v61 = vcombine.high %v249_v54, %v253_v55  ;;  %v1817_v49 = vcombine.low %v290_v37, %v294_v38 }
  0xa3   : > { %1091 = vmatprep.subr.bf16.mxu0 %v1852_v62  ;;  %1197 = vmatprep.subr.bf16.mxu1 %v1854_v63  ;;  %v1778_v62 = vcombine.high %v250_v56, %v254_v58  ;;  %v257_v63 = vld [vmem:[#allocation5 + $0x190] sm:$0xff] }
  0xa4   : > { %v1784_v5 = vcombine.high %v257_v63, %v261_v0  ;;  %v1783_v11 = vcombine.low %v257_v63, %v261_v0  ;;  %v314_v63 = vld [vmem:[#allocation5 + $0x358] sm:$0xff] }
  0xa5   : > { %v318_v0 = vld [vmem:[#allocation5 + $0x378] sm:$0xff] }
  0xa6   : > { %1092 = vmatpush1.bf16.msra.mxu0 %v1851_v2  ;;  %1198 = vmatpush1.bf16.msra.mxu1 %v1853_v3  ;;  %v262_v2 = vld [vmem:[#allocation5 + $0x1b8] sm:$0xff]  ;;  %v1775_v3 = vcombine.low %v249_v54, %v253_v55 }
  0xa7   : > { %1867 = vmatprep.subr.msk.bf16.mxu0 %vm1036_vm0, %v1860_v4  ;;  %1870 = vmatprep.subr.msk.bf16.mxu1 %vm1036_vm0, %v1862_v6  ;;  %v1777_v4 = vcombine.low %v250_v56, %v254_v58  ;;  %v265_v6 = vld [vmem:[#allocation5 + $0x1d0] sm:$0xff]  ;;  %v1785_v12 = vcombine.low %v258_v1, %v262_v2  ;;  %v306_v54 = vld [vmem:[#allocation5 + $0x318] sm:$0xff]  ;;  %v1825_v58 = vcombine.low %v298_v46, %v302_v47 }
  0xa8   : > { %v1791_v23 = vcombine.low %v265_v6, %v269_v7  ;;  %v310_v55 = vld [vmem:[#allocation5 + $0x338] sm:$0xff] }
  0xa9   : > { %1094 = vmatmul.mubr.bf16.vlgmr.msra.gmra.mrb[0].mxu0 %v2436_v8  ;;  %1200 = vmatmul.mubr.bf16.vlgmr.msra.gmra.mrb[0].mxu1 %v2436_v8 }
  0xaa   : > { %1115 = vmatpush1.bf16.msra.mxu0 %v1038_v13  ;;  %1221 = vmatpush1.bf16.msra.mxu1 %v1044_v15  ;;  %v1792_v13 = vcombine.high %v265_v6, %v269_v7  ;;  %v1794_v15 = vcombine.high %v266_v9, %v270_v10  ;;  %v322_v6 = vld [vmem:[#allocation5 + $0x398] sm:$0xff]  ;;  %v1841_v10 = vcombine.low %v314_v63, %v318_v0 }
  0xab   : > { %1103 = vmatprep.mubr.bf16.mxu0 %v2441_v14  ;;  %1209 = vmatprep.mubr.bf16.mxu1 %v2441_v14  ;;  %v326_v7 = vld [vmem:[#allocation5 + $0x3b8] sm:$0xff] }
  0xac   : > { %1273 = vmatprep.subr.bf16.mxu0 %v1736_v16  ;;  %1379 = vmatprep.subr.bf16.mxu1 %v1738_v17  ;;  %v273_v16 = vld [vmem:[#allocation5 + $0x210] sm:$0xff] }
  0xad   : > { %v277_v17 = vld [vmem:[#allocation5 + $0x230] sm:$0xff] }
  0xae   : > { %v1799_v31 = vcombine.low %v273_v16, %v277_v17 }
  0xb1   : > { %1104 = vmatmul.mubr.bf16.gmra.mrb[4].mxu0 %v2450_v18  ;;  %1210 = vmatmul.mubr.bf16.gmra.mrb[4].mxu1 %v2450_v18 }
  0xb2   : > { %1146 = vmatprep.mubr.bf16.mxu0 %v2235_v19  ;;  %1252 = vmatprep.mubr.bf16.mxu1 %v2235_v19 }
  0xb9   : > { %1868 = vmatmul.mubr.msk.bf16.vlgmr.msra.gmra.mrb[0].mxu0 %vm1029_vm1, %v2457_v22  ;;  %1871 = vmatmul.mubr.msk.bf16.vlgmr.msra.gmra.mrb[0].mxu1 %vm1029_vm1, %v2457_v22 }
  0xba   : > { %1274 = vmatpush1.bf16.msra.mxu0 %v1735_v25  ;;  %1380 = vmatpush1.bf16.msra.mxu1 %v1737_v26  ;;  %v1800_v25 = vcombine.high %v273_v16, %v277_v17  ;;  %v1802_v26 = vcombine.high %v274_v20, %v278_v21  ;;  %v330_v16 = vld [vmem:[#allocation5 + $0x3d8] sm:$0xff]  ;;  %v1849_v21 = vcombine.low %v322_v6, %v326_v7 }
  0xbb   : > { %1275 = vmatprep.subr.bf16.mxu0 %v1744_v27  ;;  %1381 = vmatprep.subr.bf16.mxu1 %v1746_v28  ;;  %v281_v27 = vld [vmem:[#allocation5 + $0x250] sm:$0xff]  ;;  %v334_v17 = vld [vmem:[#allocation5 + $0x3f8] sm:$0xff] }
  0xbc   : > { %1156 = vmatprep.mubr.bf16.mxu0 %v2235_v19  ;;  %1262 = vmatprep.mubr.bf16.mxu1 %v2235_v19  ;;  %v285_v28 = vld [vmem:[#allocation5 + $0x270] sm:$0xff] }
  0xbd   : > { %v1807_v40 = vcombine.low %v281_v27, %v285_v28 }
  0xbe   : > { %1276 = vmatpush1.bf16.msra.mxu0 %v1743_v33  ;;  %1382 = vmatpush1.bf16.msra.mxu1 %v1745_v34  ;;  %v1808_v33 = vcombine.high %v281_v27, %v285_v28  ;;  %v1810_v34 = vcombine.high %v282_v29, %v286_v30  ;;  %v1857_v28 = vcombine.low %v330_v16, %v334_v17 }
  0xbf   : > { %1277 = vmatprep.subr.bf16.mxu0 %v1752_v35  ;;  %1383 = vmatprep.subr.bf16.mxu1 %v1754_v36  ;;  %v289_v35 = vld [vmem:[#allocation5 + $0x290] sm:$0xff] }
  0xc0   : > { %v293_v36 = vld [vmem:[#allocation5 + $0x2b0] sm:$0xff] }
  0xc1   : > { %1869 = vmatmul.mubr.msk.bf16.gmra.mrb[4].mxu0 %vm1029_vm1, %v2466_v39  ;;  %1872 = vmatmul.mubr.msk.bf16.gmra.mrb[4].mxu1 %vm1029_vm1, %v2466_v39  ;;  %v1815_v48 = vcombine.low %v289_v35, %v293_v36 }
  0xc2   : > { %1278 = vmatpush1.bf16.msra.mxu0 %v1751_v42  ;;  %1384 = vmatpush1.bf16.msra.mxu1 %v1753_v43  ;;  %v1816_v42 = vcombine.high %v289_v35, %v293_v36  ;;  %v1818_v43 = vcombine.high %v290_v37, %v294_v38 }
  0xc3   : > { %1279 = vmatprep.subr.bf16.mxu0 %v1760_v44  ;;  %1385 = vmatprep.subr.bf16.mxu1 %v1762_v45  ;;  %v297_v44 = vld [vmem:[#allocation5 + $0x2d0] sm:$0xff] }
  0xc4   : > { %1305 = vmatprep.mubr.bf16.mxu0 %v2431_v57  ;;  %1411 = vmatprep.mubr.bf16.mxu1 %v2431_v57  ;;  %v1786_v57 = vcombine.high %v258_v1, %v262_v2  ;;  %v301_v45 = vld [vmem:[#allocation5 + $0x2f0] sm:$0xff]  ;;  %v1833_v2 = vcombine.low %v306_v54, %v310_v55 }
  0xc5   : > { %v1823_v56 = vcombine.low %v297_v44, %v301_v45 }
  0xc6   : > { %1280 = vmatpush1.bf16.msra.mxu0 %v1759_v50  ;;  %1386 = vmatpush1.bf16.msra.mxu1 %v1761_v51  ;;  %v1824_v50 = vcombine.high %v297_v44, %v301_v45  ;;  %v1826_v51 = vcombine.high %v298_v46, %v302_v47 }
  0xc7   : > { %1281 = vmatprep.subr.bf16.mxu0 %v1768_v52  ;;  %1387 = vmatprep.subr.bf16.mxu1 %v1770_v53  ;;  %v305_v52 = vld [vmem:[#allocation5 + $0x310] sm:$0xff] }
  0xc8   : > { %v309_v53 = vld [vmem:[#allocation5 + $0x330] sm:$0xff] }
  0xc9   : > { %v1831_v1 = vcombine.low %v305_v52, %v309_v53 }
  0xca   : > { %1282 = vmatpush1.bf16.msra.mxu0 %v1767_v59  ;;  %1388 = vmatpush1.bf16.msra.mxu1 %v1769_v60  ;;  %v1832_v59 = vcombine.high %v305_v52, %v309_v53  ;;  %v1834_v60 = vcombine.high %v306_v54, %v310_v55 }
  0xcb   : > { %1283 = vmatprep.subr.bf16.mxu0 %v1776_v61  ;;  %1389 = vmatprep.subr.bf16.mxu1 %v1778_v62  ;;  %v313_v61 = vld [vmem:[#allocation5 + $0x350] sm:$0xff] }
  0xcc   : > { %v317_v62 = vld [vmem:[#allocation5 + $0x370] sm:$0xff] }
  0xcd   : > { %v1839_v9 = vcombine.low %v313_v61, %v317_v62 }
  0xce   : > { %1284 = vmatpush1.bf16.msra.mxu0 %v1775_v3  ;;  %1390 = vmatpush1.bf16.msra.mxu1 %v1777_v4  ;;  %v1840_v3 = vcombine.high %v313_v61, %v317_v62  ;;  %v1842_v4 = vcombine.high %v314_v63, %v318_v0 }
  0xcf   : > { %1285 = vmatprep.subr.bf16.mxu0 %v1784_v5  ;;  %1391 = vmatprep.subr.bf16.mxu1 %v1786_v57  ;;  %v321_v5 = vld [vmem:[#allocation5 + $0x390] sm:$0xff] }
  0xd0   : > { %v325_v57 = vld [vmem:[#allocation5 + $0x3b0] sm:$0xff] }
  0xd1   : > { %v1847_v20 = vcombine.low %v321_v5, %v325_v57 }
  0xd2   : > { %1286 = vmatpush1.bf16.msra.mxu0 %v1783_v11  ;;  %1392 = vmatpush1.bf16.msra.mxu1 %v1785_v12  ;;  %v1848_v11 = vcombine.high %v321_v5, %v325_v57  ;;  %v1850_v12 = vcombine.high %v322_v6, %v326_v7 }
  0xd3   : > { %1287 = vmatprep.subr.bf16.mxu0 %v1792_v13  ;;  %1393 = vmatprep.subr.bf16.mxu1 %v1794_v15  ;;  %v329_v13 = vld [vmem:[#allocation5 + $0x3d0] sm:$0xff] }
  0xd4   : > { %v333_v15 = vld [vmem:[#allocation5 + $0x3f0] sm:$0xff] }
  0xd5   : > { %v1855_v27 = vcombine.low %v329_v13, %v333_v15 }
  0xd6   : > { %1288 = vmatpush1.bf16.msra.mxu0 %v1791_v23  ;;  %1394 = vmatpush1.bf16.msra.mxu1 %v1793_v24  ;;  %v1856_v23 = vcombine.high %v329_v13, %v333_v15  ;;  %v1858_v24 = vcombine.high %v330_v16, %v334_v17 }
  0xd7   : > { %1289 = vmatprep.subr.bf16.mxu0 %v1800_v25  ;;  %1395 = vmatprep.subr.bf16.mxu1 %v1802_v26  ;;  %v337_v25 = vld [vmem:[#allocation5 + $0x410] sm:$0xff]  ;;  %v338_v26 = vld [vmem:[#allocation5 + $0x418] sm:$0xff] }
  0xd8   : > { %v1864_v29 = vcombine.high %v337_v25, %v337_v25  ;;  %v1863_v30 = vcombine.low %v337_v25, %v337_v25 }
  0xda   : > { %1290 = vmatpush1.bf16.msra.mxu0 %v1799_v31  ;;  %1396 = vmatpush1.bf16.msra.mxu1 %v1801_v32  ;;  %v1866_v31 = vcombine.high %v338_v26, %v338_v26  ;;  %v1865_v32 = vcombine.low %v338_v26, %v338_v26 }
  0xdb   : > { %1291 = vmatprep.subr.bf16.mxu0 %v1808_v33  ;;  %1397 = vmatprep.subr.bf16.mxu1 %v1810_v34  ;;  %v1050_v33 = vsel %vm1036_vm0, %v1863_v30, 0 }
  0xdc   : > { %v1056_v34 = vsel %vm1036_vm0, %v1865_v32, 0 }
  0xde   : > { %1292 = vmatpush1.bf16.msra.mxu0 %v1807_v40  ;;  %1398 = vmatpush1.bf16.msra.mxu1 %v1809_v41 }
  0xdf   : > { %1293 = vmatprep.subr.bf16.mxu0 %v1816_v42  ;;  %1399 = vmatprep.subr.bf16.mxu1 %v1818_v43 }
  0xe2   : > { %1294 = vmatpush1.bf16.msra.mxu0 %v1815_v48  ;;  %1400 = vmatpush1.bf16.msra.mxu1 %v1817_v49 }
  0xe3   : > { %1295 = vmatprep.subr.bf16.mxu0 %v1824_v50  ;;  %1401 = vmatprep.subr.bf16.mxu1 %v1826_v51 }
  0xe6   : > { %1296 = vmatpush1.bf16.msra.mxu0 %v1823_v56  ;;  %1402 = vmatpush1.bf16.msra.mxu1 %v1825_v58 }
  0xe7   : > { %1297 = vmatprep.subr.bf16.mxu0 %v1832_v59  ;;  %1403 = vmatprep.subr.bf16.mxu1 %v1834_v60 }
  0xea   : > { %1298 = vmatpush1.bf16.msra.mxu0 %v1831_v1  ;;  %1404 = vmatpush1.bf16.msra.mxu1 %v1833_v2 }
  0xeb   : > { %1299 = vmatprep.subr.bf16.mxu0 %v1840_v3  ;;  %1405 = vmatprep.subr.bf16.mxu1 %v1842_v4 }
  0xee   : > { %1300 = vmatpush1.bf16.msra.mxu0 %v1839_v9  ;;  %1406 = vmatpush1.bf16.msra.mxu1 %v1841_v10 }
  0xef   : > { %1301 = vmatprep.subr.bf16.mxu0 %v1848_v11  ;;  %1407 = vmatprep.subr.bf16.mxu1 %v1850_v12 }
  0xf2   : > { %1302 = vmatpush1.bf16.msra.mxu0 %v1847_v20  ;;  %1408 = vmatpush1.bf16.msra.mxu1 %v1849_v21 }
  0xf3   : > { %1303 = vmatprep.subr.bf16.mxu0 %v1856_v23  ;;  %1409 = vmatprep.subr.bf16.mxu1 %v1858_v24 }
  0xf6   : > { %1304 = vmatpush1.bf16.msra.mxu0 %v1855_v27  ;;  %1410 = vmatpush1.bf16.msra.mxu1 %v1857_v28 }
  0xf7   : > { %1873 = vmatprep.subr.msk.bf16.mxu0 %vm1036_vm0, %v1864_v29  ;;  %1876 = vmatprep.subr.msk.bf16.mxu1 %vm1036_vm0, %v1866_v31 }
  0xf9   : > { %1306 = vmatmul.mubr.bf16.vlgmr.msra.gmra.mrb[8].mxu0 %v2436_v8  ;;  %1412 = vmatmul.mubr.bf16.vlgmr.msra.gmra.mrb[8].mxu1 %v2436_v8 }
  0xfa   : > { %1327 = vmatpush1.bf16.msra.mxu0 %v1050_v33  ;;  %1433 = vmatpush1.bf16.msra.mxu1 %v1056_v34 }
  0xfb   : > { %1315 = vmatprep.mubr.bf16.mxu0 %v2441_v14  ;;  %1421 = vmatprep.mubr.bf16.mxu1 %v2441_v14 }
 0x101   : > { %1316 = vmatmul.mubr.bf16.gmra.mrb[12].mxu0 %v2450_v18  ;;  %1422 = vmatmul.mubr.bf16.gmra.mrb[12].mxu1 %v2450_v18 }
 0x102   : > { %1358 = vmatprep.mubr.bf16.mxu0 %v2235_v19  ;;  %1464 = vmatprep.mubr.bf16.mxu1 %v2235_v19 }
 0x109   : > { %1874 = vmatmul.mubr.msk.bf16.vlgmr.msra.gmra.mrb[8].mxu0 %vm1029_vm1, %v2457_v22  ;;  %1877 = vmatmul.mubr.msk.bf16.vlgmr.msra.gmra.mrb[8].mxu1 %vm1029_vm1, %v2457_v22 }
 0x10a   : > { %1368 = vmatprep.mubr.bf16.mxu0 %v2235_v19  ;;  %1474 = vmatprep.mubr.bf16.mxu1 %v2235_v19 }
 0x111   : > { %1875 = vmatmul.mubr.msk.bf16.gmra.mrb[12].mxu0 %vm1029_vm1, %v2466_v39  ;;  %1878 = vmatmul.mubr.msk.bf16.gmra.mrb[12].mxu1 %vm1029_vm1, %v2466_v39 }
 0x18c   : > { %v1148_v8 = vpop.f32.mrb[0].mxu0  ;;  %v1254_v14 = vpop.f32.mrb[0].mxu1 }
 0x18d   : > { %v1150_v18 = vpop.f32.mrb[1].mxu0  ;;  %v1256_v36 = vpop.f32.mrb[1].mxu1 }
 0x18e   : > { %v1902_v35 = vpack.c.bf16 %v1150_v18, %v1148_v8  ;;  %v1152_v37 = vpop.f32.mrb[2].mxu0  ;;  %v1903_v38 = vpack.c.bf16 %v1256_v36, %v1254_v14  ;;  %v1258_v40 = vpop.f32.mrb[2].mxu1 }
 0x18f   : > { %v1154_v22 = vpop.f32.mrb[3].mxu0  ;;  %v1260_v39 = vpop.f32.mrb[3].mxu1 }
 0x190   : > { %1581 = vst [vmem:[%s2497_s21] sm:$0xff] %v1902_v35  ;;  %v1906_v19 = vpack.c.bf16 %v1154_v22, %v1152_v37  ;;  %1582 = vst [vmem:[%s2497_s21 + $0x8] sm:$0xff] %v1903_v38  ;;  %v1907_v41 = vpack.c.bf16 %v1260_v39, %v1258_v40 }
 0x192   : > { %1585 = vst [vmem:[%s2497_s21 + $0x20] sm:$0xff] %v1906_v19  ;;  %1586 = vst [vmem:[%s2497_s21 + $0x28] sm:$0xff] %v1907_v41 }
 0x194   : > { %v1158_v42 = vpop.f32.mrb[4].mxu0  ;;  %v1264_v43 = vpop.f32.mrb[4].mxu1 }
 0x195   : > { %v1160_v44 = vpop.f32.mrb[5].mxu0  ;;  %v1266_v46 = vpop.f32.mrb[5].mxu1 }
 0x196   : > { %v1910_v45 = vpack.c.bf16 %v1160_v44, %v1158_v42  ;;  %v1162_v47 = vpop.f32.mrb[6].mxu0  ;;  %v1911_v48 = vpack.c.bf16 %v1266_v46, %v1264_v43  ;;  %v1268_v49 = vpop.f32.mrb[6].mxu1 }
 0x197   : > { %v1164_v50 = vpop.f32.mrb[7].mxu0  ;;  %v1270_v52 = vpop.f32.mrb[7].mxu1 }
 0x198   : > { %1589 = vst [vmem:[%s2497_s21 + $0x40] sm:$0xff] %v1910_v45  ;;  %v1914_v51 = vpack.c.bf16 %v1164_v50, %v1162_v47  ;;  %1590 = vst [vmem:[%s2497_s21 + $0x48] sm:$0xff] %v1911_v48  ;;  %v1915_v53 = vpack.c.bf16 %v1270_v52, %v1268_v49 }
 0x19a   : > { %1593 = vst [vmem:[%s2497_s21 + $0x60] sm:$0xff] %v1914_v51  ;;  %1594 = vst [vmem:[%s2497_s21 + $0x68] sm:$0xff] %v1915_v53 }
 0x1dc   : > { %v1360_v54 = vpop.f32.mrb[8].mxu0  ;;  %v1466_v55 = vpop.f32.mrb[8].mxu1 }
 0x1dd   : > { %v1362_v56 = vpop.f32.mrb[9].mxu0  ;;  %v1468_v59 = vpop.f32.mrb[9].mxu1 }
 0x1de   : > { %v1904_v58 = vpack.c.bf16 %v1362_v56, %v1360_v54  ;;  %v1364_v60 = vpop.f32.mrb[10].mxu0  ;;  %v1905_v61 = vpack.c.bf16 %v1468_v59, %v1466_v55  ;;  %v1470_v62 = vpop.f32.mrb[10].mxu1 }
 0x1df   : > { %v1366_v63 = vpop.f32.mrb[11].mxu0  ;;  %v1472_v1 = vpop.f32.mrb[11].mxu1 }
 0x1e0   : > { %1583 = vst [vmem:[%s2497_s21 + $0x10] sm:$0xff] %v1904_v58  ;;  %v1908_v0 = vpack.c.bf16 %v1366_v63, %v1364_v60  ;;  %1584 = vst [vmem:[%s2497_s21 + $0x18] sm:$0xff] %v1905_v61  ;;  %v1909_v2 = vpack.c.bf16 %v1472_v1, %v1470_v62 }
 0x1e2   : > { %1587 = vst [vmem:[%s2497_s21 + $0x30] sm:$0xff] %v1908_v0  ;;  %1588 = vst [vmem:[%s2497_s21 + $0x38] sm:$0xff] %v1909_v2 }
 0x1e4   : > { %v1370_v3 = vpop.f32.mrb[12].mxu0  ;;  %v1476_v4 = vpop.f32.mrb[12].mxu1 }
 0x1e5   : > { %v1372_v5 = vpop.f32.mrb[13].mxu0  ;;  %v1478_v6 = vpop.f32.mrb[13].mxu1 }
 0x1e6   : > { %v1912_v57 = vpack.c.bf16 %v1372_v5, %v1370_v3  ;;  %v1374_v7 = vpop.f32.mrb[14].mxu0  ;;  %v1913_v9 = vpack.c.bf16 %v1478_v6, %v1476_v4  ;;  %v1480_v10 = vpop.f32.mrb[14].mxu1 }
 0x1e7   : > { %v1376_v11 = vpop.f32.mrb[15].mxu0  ;;  %v1482_v13 = vpop.f32.mrb[15].mxu1 }
 0x1e8   : > { %1591 = vst [vmem:[%s2497_s21 + $0x50] sm:$0xff] %v1912_v57  ;;  %v1916_v12 = vpack.c.bf16 %v1376_v11, %v1374_v7  ;;  %1592 = vst [vmem:[%s2497_s21 + $0x58] sm:$0xff] %v1913_v9  ;;  %v1917_v15 = vpack.c.bf16 %v1482_v13, %v1480_v10 }
 0x1ea   : > { %1595 = vst [vmem:[%s2497_s21 + $0x70] sm:$0xff] %v1916_v12  ;;  %1596 = vst [vmem:[%s2497_s21 + $0x78] sm:$0xff] %v1917_v15 }
 0x1eb   : > { %2138 = shalt.err (!%p2135_p7)
}
 0x1ec   : > { %s2139_s4 = scalar_lea.hbm %s2518_s27, 2048  ;;  %s2143_s1 = scalar_lea.hbm %s2579_s2, 8192 }
 0x1ed   : > { %p2140_p1 = scmp.ne.s32.totalorder %s2518_s27, %s2139_s4  ;;  %p2144_p5 = scmp.lt.u32.totalorder %s2518_s27, %s2579_s2 }
 0x1ee   : > { %p2145_p9 = scmp.lt.u32.totalorder %s2143_s1, %s2139_s4  ;;  %p2147_p6 = scmp.lt.u32.totalorder %s2139_s4, %s2518_s27 }
 0x1ef   : > { %p2141_p2 = pnand %p2140_p1, %p2359_p11 }
 0x1f0   : > { %p2146_p0 = por %p2145_p9, %p2144_p5 }
 0x1f1   : > { %p2142_p4 = pneg %p2141_p2 }
 0x1f2   : > { %p2148_p8 = por %p2147_p6, %p2146_p0 }
 0x1f4   : > { %p2149_p10 = pnand %p2148_p8, %p2142_p4 }
 0x1f6   : > { %2152 = shalt.err (!%p2149_p10)
}
 0x1f7   : > { %s2237_s23 = smov 512   ;;  %s2238_s7 = smov 32  }
 0x1f8   : > { %1961 = dma.vmem_to_hbm [thread:$0]  (%p2359_p11), %s2520_s3, 2048, %s2518_s27, %s1598_s25, %s2237_s23, %s2237_s23, %s2238_s7  }
 0x1f9 PF: > { %p1978_p12 = scmp.ge.s32.totalorder %s2227_s16, 2  ;;  %s1629_s18 = sand.u32 1, %s2199_s9  }
 0x1fa   : > { %p2602_p13 = scmp.ne.s32.totalorder %s2590_s22, 0  ;;  %s1630_s29 = scalar_lea.sflag [#allocation4], %s1629_s18 }
 0x1fc   : > { %p1972_p3 = pnand %p1978_p12, %p2602_p13 }
 0x1fe   : > { %2194 = dma.done.wait (!%p1972_p3), %s1630_s29, 2048  }
 0x1ff   : > { %2196 = vsyncadd (!%p1972_p3), %s1630_s29, 4294965248  ;;  %s19_s16 = sadd.s32 1, %s2227_s16   ;;  %s2603_s26 = sld [smem:[#allocation11_spill]] }
 0x200   : > { %p16_p7 = scmp.ge.s32.totalorder %s19_s16, 6   ;;  %s2604_s28 = sld [smem:[#allocation12_spill]] }
 0x201   : > { %s2605_s9 = smov %s2203_s10  ;;  %s2606_s10 = smov %s2207_s11 }
 0x202   : > { %s2607_s11 = smov %s2376_s20  ;;  %s2608_s12 = smov %s2219_s14 }
 0x203   : > { %s2609_s13 = smov %s2223_s15  ;;  %18 = sbr.rel (!%p16_p7) target bundleno = 10 (0xa), region = 77 }
 0x205   : > { %s2610_s14 = smov %s2603_s26 }
 0x206   : > { %s2611_s15 = smov %s2604_s28 }
 0x20a   :  { %1635 = vsyncpa [#allocation3], 1 }
 0x20b   :  { %1637 = vsyncpa [#allocation3 + $0x1], 1 }
 0x20c   :  { %1638 = vsyncpa [#allocation6], 1 }
 0x20d   :  { %1639 = vsyncpa [#allocation4], 1 }
 0x20e   :  { %1641 = vsyncpa [#allocation4 + $0x1], 1 }

</bundles_post_ra>
